<compile_context>
chip_gen: v7x
topology: tpu7x:2x2x1
jax: 0.10.0
libtpu: 0.0.40
codegen_flags: <defaults>
</compile_context>

<pallas_src>
import functools

import jax
import jax.numpy as jnp
from jax.experimental import pallas as pl
from jax.experimental.pallas import tpu as pltpu


# --------------------------------- kernel -----------------------------------

def _obs_encoder_kernel(x_ref, w_ref, b_ref, o_ref):
    """One row-block of y = x @ W + b, computed on the VPU.

    x_ref: (TR, K)   observation tile (K = 4)
    w_ref: (K, D)    encoder weight (already transposed vs. PyTorch layout)
    b_ref: (1, D)    encoder bias
    o_ref: (TR, D)   output tile
    """
    x = x_ref[...]                     # (TR, K) f32
    w = w_ref[...]                     # (K, D)  f32
    K = x.shape[-1]

    # K is tiny (4): contract as a sum of rank-1 broadcasts -> 4 VPU FMAs,
    # skipping the systolic array entirely (MXU fill would be 4/128..4/256).
    acc = x[:, 0:1] * w[0:1, :]
    for i in range(1, K):
        acc = acc + x[:, i:i + 1] * w[i:i + 1, :]

    o_ref[...] = acc + b_ref[...]      # lane-dense (TR, 128) store


# -------------------------------- wrapper ------------------------------------

def observation_encoder_forward(params, x, *, block_rows=8):
    """Applies Linear(4, d_model) to the last axis of `x` (any leading dims)."""
    w = params["w"]                    # (4, D)
    b = params["b"]                    # (1, D)
    K, D = w.shape
    lead = x.shape[:-1]

    xf = x.reshape(-1, K)              # wrapper-side reshape (free in XLA)
    n = xf.shape[0]
    pad = (-n) % block_rows
    if pad:
        xf = jnp.concatenate([xf, jnp.zeros((pad, K), xf.dtype)], axis=0)
    n_padded = xf.shape[0]

    out = pl.pallas_call(
        _obs_encoder_kernel,
        out_shape=jax.ShapeDtypeStruct((n_padded, D), jnp.float32),
        grid=(n_padded // block_rows,),
        in_specs=[
            pl.BlockSpec((block_rows, K), lambda i: (i, 0)),   # obs rows
            pl.BlockSpec((K, D), lambda i: (0, 0)),            # weight (resident)
            pl.BlockSpec((1, D), lambda i: (0, 0)),            # bias   (resident)
        ],
        out_specs=pl.BlockSpec((block_rows, D), lambda i: (i, 0)),
        compiler_params=pltpu.CompilerParams(
            dimension_semantics=("parallel",)),                # megacore on v7x
    )(xf, w, b)

    if pad:
        out = out[:n]
    return out.reshape(*lead, D)


# ----------------------------- parameter init --------------------------------

def init_params(key, *, d_model):
    kw, kb = jax.random.split(key)
    # Stored as (in_features, out_features) so the kernel computes x @ W + b,
    # numerically identical to PyTorch's x @ W.T + b with W of shape (out, in).
    return {
        "w": 0.05 * jax.random.normal(kw, (4, d_model), jnp.float32),
        "b": 0.05 * jax.random.normal(kb, (1, d_model), jnp.float32),
    }


# --------------------------- pure-JAX reference -------------------------------

def reference_forward(params, x):
    return x @ params["w"] + params["b"][0]


# ----------------------------------- main -------------------------------------

if __name__ == "__main__":
    B, S, d_model = 2, 8, 128          # d_model chosen lane-dense (128 lanes)

    key = jax.random.PRNGKey(0)
    k_par, k_obs = jax.random.split(key)
    params = init_params(k_par, d_model=d_model)
    x = jax.random.normal(k_obs, (B, S, 4), jnp.float32)

    fwd = jax.jit(functools.partial(observation_encoder_forward, block_rows=8))
    y = fwd(params, x)
    jax.block_until_ready(y)

    y_ref = reference_forward(params, x)
    assert y.shape == (B, S, d_model)
    assert jnp.allclose(y, y_ref, atol=1e-5, rtol=1e-5)

    print("KERNEL_OK")
</pallas_src>

<mosaic_0001>
module attributes {stable_mosaic.version = 11 : i64} {
  func.func @_obs_encoder_kernel(%arg0: i32, %arg1: memref<8x4xf32, #tpu.memory_space<vmem>>, %arg2: memref<4x128xf32, #tpu.memory_space<vmem>>, %arg3: memref<1x128xf32, #tpu.memory_space<vmem>>, %arg4: memref<8x128xf32, #tpu.memory_space<vmem>>) attributes {dimension_semantics = [#tpu.dimension_semantics<parallel>], iteration_bounds = array<i64: 2>, scalar_prefetch = 0 : i64, scratch_operands = 0 : i64, tpu.core_type = #tpu.core_type<tc>, window_params = [{transform_indices = @transform_0, window_bounds = array<i64: 8, 4>}, {pipeline_mode = #tpu.pipeline_mode<synchronous>, transform_indices = @transform_1, window_bounds = array<i64: 4, 128>}, {pipeline_mode = #tpu.pipeline_mode<synchronous>, transform_indices = @transform_2, window_bounds = array<i64: 1, 128>}, {transform_indices = @transform_3, window_bounds = array<i64: 8, 128>}]} {
    %c0 = arith.constant 0 : index
    %c0_0 = arith.constant 0 : index
    %0 = vector.load %arg1[%c0, %c0_0] : memref<8x4xf32, #tpu.memory_space<vmem>>, vector<8x4xf32>
    %c0_1 = arith.constant 0 : index
    %c0_2 = arith.constant 0 : index
    %1 = vector.load %arg2[%c0_1, %c0_2] : memref<4x128xf32, #tpu.memory_space<vmem>>, vector<4x128xf32>
    %2 = vector.extract_strided_slice %0 {offsets = [0, 0], sizes = [8, 1], strides = [1, 1]} : vector<8x4xf32> to vector<8x1xf32>
    %3 = vector.extract_strided_slice %1 {offsets = [0, 0], sizes = [1, 128], strides = [1, 1]} : vector<4x128xf32> to vector<1x128xf32>
    %4 = vector.broadcast %2 : vector<8x1xf32> to vector<8x128xf32>
    %5 = vector.broadcast %3 : vector<1x128xf32> to vector<8x128xf32>
    %6 = arith.mulf %4, %5 : vector<8x128xf32>
    %7 = vector.extract_strided_slice %0 {offsets = [0, 1], sizes = [8, 1], strides = [1, 1]} : vector<8x4xf32> to vector<8x1xf32>
    %8 = vector.extract_strided_slice %1 {offsets = [1, 0], sizes = [1, 128], strides = [1, 1]} : vector<4x128xf32> to vector<1x128xf32>
    %9 = vector.broadcast %7 : vector<8x1xf32> to vector<8x128xf32>
    %10 = vector.broadcast %8 : vector<1x128xf32> to vector<8x128xf32>
    %11 = arith.mulf %9, %10 : vector<8x128xf32>
    %12 = arith.addf %6, %11 : vector<8x128xf32>
    %13 = vector.extract_strided_slice %0 {offsets = [0, 2], sizes = [8, 1], strides = [1, 1]} : vector<8x4xf32> to vector<8x1xf32>
    %14 = vector.extract_strided_slice %1 {offsets = [2, 0], sizes = [1, 128], strides = [1, 1]} : vector<4x128xf32> to vector<1x128xf32>
    %15 = vector.broadcast %13 : vector<8x1xf32> to vector<8x128xf32>
    %16 = vector.broadcast %14 : vector<1x128xf32> to vector<8x128xf32>
    %17 = arith.mulf %15, %16 : vector<8x128xf32>
    %18 = arith.addf %12, %17 : vector<8x128xf32>
    %19 = vector.extract_strided_slice %0 {offsets = [0, 3], sizes = [8, 1], strides = [1, 1]} : vector<8x4xf32> to vector<8x1xf32>
    %20 = vector.extract_strided_slice %1 {offsets = [3, 0], sizes = [1, 128], strides = [1, 1]} : vector<4x128xf32> to vector<1x128xf32>
    %21 = vector.broadcast %19 : vector<8x1xf32> to vector<8x128xf32>
    %22 = vector.broadcast %20 : vector<1x128xf32> to vector<8x128xf32>
    %23 = arith.mulf %21, %22 : vector<8x128xf32>
    %24 = arith.addf %18, %23 : vector<8x128xf32>
    %c0_3 = arith.constant 0 : index
    %c0_4 = arith.constant 0 : index
    %25 = vector.load %arg3[%c0_3, %c0_4] : memref<1x128xf32, #tpu.memory_space<vmem>>, vector<1x128xf32>
    %26 = vector.broadcast %25 : vector<1x128xf32> to vector<8x128xf32>
    %27 = arith.addf %24, %26 : vector<8x128xf32>
    %c0_5 = arith.constant 0 : index
    %c0_6 = arith.constant 0 : index
    %28 = vector.load %arg4[%c0_5, %c0_6] : memref<8x128xf32, #tpu.memory_space<vmem>>, vector<8x128xf32>
    tpu.vector_store %arg4[%c0_5, %c0_6], %27 {strides = array<i32>} : memref<8x128xf32, #tpu.memory_space<vmem>>, vector<8x128xf32>,
    return
  }
  func.func @transform_0(%arg0: i32) -> (i32, i32) {
    %c0_i32 = arith.constant 0 : i32
    %c0_i32_0 = arith.constant 0 : i32
    return %arg0, %c0_i32 : i32, i32
  }
  func.func @transform_1(%arg0: i32) -> (i32, i32) {
    %c0_i32 = arith.constant 0 : i32
    %c0_i32_0 = arith.constant 0 : i32
    %c0_i32_1 = arith.constant 0 : i32
    return %c0_i32, %c0_i32_0 : i32, i32
  }
  func.func @transform_2(%arg0: i32) -> (i32, i32) {
    %c0_i32 = arith.constant 0 : i32
    %c0_i32_0 = arith.constant 0 : i32
    %c0_i32_1 = arith.constant 0 : i32
    return %c0_i32, %c0_i32_0 : i32, i32
  }
  func.func @transform_3(%arg0: i32) -> (i32, i32) {
    %c0_i32 = arith.constant 0 : i32
    %c0_i32_0 = arith.constant 0 : i32
    return %arg0, %c0_i32 : i32, i32
  }
}

</mosaic_0001>

<bundles_post_ra>
// kernel: observation_encoder_forward.1
= control target key start
LH: loop header
LB: loop body
LE: loop exit
PB: predicated region body
PF: predicated region fallthrough
CT: control target
= control target key end

     0   :  { %8 = vsyncpa [#allocation3], 0  ;;  %s544_s0 = inlined_call_operand.vmem [shape: f32[16,4], index: 0, kind: input, shape index: {}]   ;;  %s545_s1 = inlined_call_operand.vmem [shape: f32[4,128], index: 1, kind: input, shape index: {}]   ;;  %s546_s2 = inlined_call_operand.vmem [shape: f32[1,128], index: 2, kind: input, shape index: {}]   ;;  %s547_s3 = inlined_call_operand.hbm [shape: f32[16,128], index: 3, kind: output, shape index: {}]  }
   0x1   :  { %10 = vsyncpa [#allocation3 + $0x1], 0  ;;  %s438_s12 = smov 0   ;;  %s440_s13 = smov 0  }
   0x2   :  { %s442_s14 = smov 0   ;;  %s444_s15 = smov 0  }
   0x3 LB: > { %s459_s16 = sadd.s32 4294967295, %s411_s15   ;;  %s290_s17 = sadd.s32 4294967294, %s411_s15   ;;  %s411_s15 = sphi %s444_s15, %s553_s15   ;;  %s407_s14 = sphi %s442_s14, %s552_s14   ;;  %s403_s13 = sphi %s440_s13, %s551_s13   ;;  %s399_s12 = sphi %s438_s12, %s550_s12  }
   0x4   : > { %s463_s18 = sadd.s32 1, %s411_s15   ;;  %s91_s19 = sadd.s32 1, %s407_s14 }
   0x5   : > { %s88_s20 = ssub.s32 %s411_s15, %s463_s18  ;;  %p101_p0 = scmp.ne.s32.totalorder %s407_s14, %s403_s13 }
   0x6   : > { %p89_p1 = scmp.eq.s32.totalorder %s88_s20, 0  ;;  %p102_p2 = scmp.eq.s32.totalorder %s459_s16, 1 }
   0x7   : > { %p107_p3 = scmp.ne.s32.totalorder %s403_s13, %s399_s12  ;;  %p108_p4 = scmp.eq.s32.totalorder %s290_s17, 1 }
   0x8   : > { %s474_s21 = scalar_select %p89_p1, %s407_s14, %s91_s19  }
   0x9   : > { %p476_p5 = por %p102_p2, %p101_p0  ;;  %p480_p6 = por %p108_p4, %p107_p3 }
   0xa   : > { %p293_p7 = scmp.ge.s32.totalorder %s411_s15, 1  ;;  %p139_p8 = scmp.lt.s32.totalorder %s411_s15, 3 }
   0xc   : > { %p140_p9 = pnand %p293_p7, %p139_p8 }
   0xd   : > { %p162_p10 = scmp.lt.s32.totalorder (!%p140_p9), %s459_s16, 1  ;;  %v413_v0 = vmov (!%p140_p9), 0   ;;  %v414_v1 = vmov (!%p140_p9), 2   ;;  %v415_v3 = vmov (!%p140_p9), 1   ;;  %v416_v4 = vmov (!%p140_p9), 3   ;;  %s159_s4 = sand.u32 (!%p140_p9), 1, %s403_s13  }
   0xe   : > { %143 = sbr.rel (%p140_p9) target bundleno = 183 (0xb7), region = 32  ;;  %344 = vset.pattern.permute.xlu0 (!%p140_p9), %v413_v0  ;;  %346 = vset.pattern.permute.xlu1 (!%p140_p9), %v414_v1  ;;  %v173_v5 = vlaneseq (!%p140_p9)  ;;  %v167_v9 = vld [vmem:[%s545_s1] sm:$0xf] (!%p140_p9)  ;;  %s294_s5 = sshll.u32 (!%p140_p9), %s159_s4, 3 }
   0xf   : > { %v296_v26 = vld [vmem:[%s546_s2] ss:$0 sm:$0xff] (!%p140_p9)  ;;  %s298_s8 = sshll.u32 (!%p140_p9), %s459_s16, 7  ;;  %s161_s9 = scalar_lea.vmem (!%p140_p9), [#allocation2], %s294_s5 }
  0x10   : > { %v174_v6 = vshrl.u32 (!%p140_p9), %v173_v5, 7  ;;  %s231_s10 = sshll.u32 (!%p140_p9), %s161_s9, 4  ;;  %s502_s19 = scalar_lea.hbm (!%p140_p9), %s547_s3, %s298_s8  ;;  %s504_s10 = int_to_ptr.vmem [resolvable:$true] %s231_s10 }
  0x11   : > { %s218_s20 = scalar_lea.sflag (!%p140_p9), [#allocation3], %s159_s4 }
  0x12   : > { %v175_v7 = vsub.s32 (!%p140_p9), 0, %v174_v6  ;;  %v184_v8 = vsub.s32 (!%p140_p9), 1, %v174_v6  ;;  %v194_v11 = vsub.s32 (!%p140_p9), 2, %v174_v6  ;;  %v204_v13 = vsub.s32 (!%p140_p9), 3, %v174_v6 }
  0x14   : > { %v176_v14 = vrot.slane (!%p140_p9), %v167_v9, %v175_v7  ;;  %v185_v15 = vrot.slane (!%p140_p9), %v167_v9, %v184_v8  ;;  %v195_v16 = vrot.slane (!%p140_p9), %v167_v9, %v194_v11  ;;  %v205_v17 = vrot.slane (!%p140_p9), %v167_v9, %v204_v13 }
  0x15   : > { %s163_s24 = scalar_select %p162_p10, %s459_s16, 1 }
  0x16   : > { %s417_s16 = smov [#allocation2]  }
  0x17   : > { %s295_s25 = sshll.u32 %s163_s24, 3  ;;  %s349_s24 = scalar_lea.vmem %s504_s10, 128 }
  0x18   : > { %s165_s28 = scalar_lea.vmem %s544_s0, %s295_s25  ;;  %p350_p11 = scmp.ne.s32.totalorder %s504_s10, %s349_s24 }
  0x19   : > { %v166_v2 = vld [vmem:[%s165_s28] sm:$0xff]  ;;  %s353_s25 = sshll.u32 %s417_s16, 4  ;;  %s354_s25 = int_to_ptr.vmem [resolvable:$false] %s353_s25 }
  0x1a   : > { %170 = vperm.xlu0 %344, %v166_v2   ;;  %189 = vperm.xlu1 %346, %v166_v2   ;;  %p351_p12 = pnand %p350_p11, %p476_p5  ;;  %s355_s26 = scalar_lea.vmem %s354_s25, 256 }
  0x1b   : > { %p356_p0 = scmp.lt.s32.totalorder %s504_s10, %s354_s25  ;;  %p357_p1 = scmp.lt.s32.totalorder %s355_s26, %s349_s24 }
  0x1c   : > { %p352_p13 = pneg %p351_p12 }
  0x1d   : > { %p358_p2 = por %p357_p1, %p356_p0 }
  0x1e   : > { %345 = vset.pattern.permute.xlu0 %v415_v3  ;;  %347 = vset.pattern.permute.xlu1 %v416_v4 }
  0x1f   : > { %179 = vperm.xlu0 %345, %v166_v2   ;;  %199 = vperm.xlu1 %347, %v166_v2   ;;  %p359_p3 = pnand %p358_p2, %p352_p13 }
  0x23   : > { %348 = vset.pattern.permute.xlu0 %v416_v4 }
  0x99   : > { %v171_v10 = vpop.permute.xlu0 %170  ;;  %v190_v12 = vpop.permute.xlu1 %189 }
  0x9a   : > { %v177_v20 = vmul.f32 %v176_v14, %v171_v10  ;;  %v196_v22 = vmul.f32 %v195_v16, %v190_v12 }
  0x9e   : > { %v180_v18 = vpop.permute.xlu0 %179  ;;  %v200_v19 = vpop.permute.xlu1 %199 }
  0x9f   : > { %v186_v21 = vmul.f32 %v185_v15, %v180_v18  ;;  %v206_v24 = vmul.f32 %v205_v17, %v200_v19 }
  0xa1   : > { %v187_v23 = vadd.f32 %v186_v21, %v177_v20 }
  0xa3   : > { %v197_v25 = vadd.f32 %v196_v22, %v187_v23 }
  0xa5   : > { %v207_v27 = vadd.f32 %v206_v24, %v197_v25 }
  0xa7   : > { %v215_v28 = vadd.f32 %v296_v26, %v207_v27 }
  0xa9   : > { %216 = vst [vmem:[%s161_s9] sm:$0xff] %v215_v28 }
  0xaa   : > { %362 = shalt.err (!%p359_p3)
}
  0xab   : > { %s363_s27 = scalar_lea.hbm %s502_s19, 128  ;;  %s367_s30 = scalar_lea.hbm %s547_s3, 256 }
  0xac   : > { %p364_p4 = scmp.ne.s32.totalorder %s502_s19, %s363_s27  ;;  %p368_p9 = scmp.lt.u32.totalorder %s502_s19, %s547_s3 }
  0xad   : > { %p369_p10 = scmp.lt.u32.totalorder %s367_s30, %s363_s27  ;;  %p371_p12 = scmp.lt.u32.totalorder %s363_s27, %s502_s19 }
  0xae   : > { %p365_p7 = pnand %p364_p4, %p476_p5 }
  0xaf   : > { %p370_p11 = por %p369_p10, %p368_p9 }
  0xb0   : > { %p366_p8 = pneg %p365_p7 }
  0xb1   : > { %p372_p13 = por %p371_p12, %p370_p11 }
  0xb3   : > { %p373_p0 = pnand %p372_p13, %p366_p8 }
  0xb5   : > { %376 = shalt.err (!%p373_p0)
}
  0xb6   : > { %301 = dma.vmem_to_hbm [thread:$0]  (%p476_p5), %s504_s10, 128, %s502_s19, %s218_s20  }
  0xb7 PF: > { %p307_p1 = scmp.ge.s32.totalorder %s411_s15, 2  ;;  %s243_s6 = sand.u32 1, %s399_s12  }
  0xb8   : > { %s244_s7 = scalar_lea.sflag [#allocation3], %s243_s6 }
  0xb9   : > { %p304_p2 = pnand %p307_p1, %p480_p6 }
  0xbb   : > { %394 = dma.done.wait (!%p304_p2), %s244_s7, 128  }
  0xbc   : > { %396 = vsyncadd (!%p304_p2), %s244_s7, 4294967168  ;;  %p13_p3 = scmp.ge.s32.totalorder %s463_s18, 4   ;;  %s550_s12 = smov %s403_s13 }
  0xbd   : > { %s551_s13 = smov %s407_s14  ;;  %s552_s14 = smov %s474_s21 }
  0xbe   : > { %s553_s15 = smov %s463_s18  ;;  %15 = sbr.rel (!%p13_p3) target bundleno = 3 (0x3), region = 67 }
  0xc5   :  { %249 = vsyncpa [#allocation3], 1 }
  0xc6   :  { %251 = vsyncpa [#allocation3 + $0x1], 1 }

</bundles_post_ra>
